<compile_context>
chip_gen: v6e
topology: v6e:2x2x1
jax: 0.10.0
libtpu: 0.0.40
codegen_flags: <defaults>
</compile_context>

<pallas_src>
import jax
import jax.numpy as jnp
from jax.experimental import pallas as pl
from jax.experimental.pallas import tpu as pltpu

# ---------------- config (small synthetic sizes consistent with the module) ---------
HIDDEN = 32      # config.hidden_size
N_HANDS = 14     # self.n_hands
BATCH = 2
SEQ = 24         # must be >= N_HANDS + 1 so hidden_states[:, 1:15] is valid
# NOTE: the constructor's `output_dim` argument is unused by the module's forward.


def discard_head_kernel(h_ref, w_ref, b_ref, out_ref):
    # h_ref: (B, S, H) f32 ; w_ref: (1, H) f32 ; b_ref: (1, 1) f32 ; out_ref: (B, N_HANDS) f32
    h = h_ref[...]                                   # full aligned block
    w = w_ref[0, :]                                  # (H,)
    # dense(hidden_size -> 1): per-position dot over H.
    # At H=32 / out_features=1 this is far below MXU-native shape, so a VPU multiply
    # + lane reduce is the cheap path (no one-hot / matmul machinery needed).
    scores = jnp.sum(h * w, axis=-1) + b_ref[0, 0]   # (B, S)
    # seq slice 1 .. N_HANDS applied on the tiny 2-D result.
    out_ref[...] = scores[:, 1:N_HANDS + 1].astype(out_ref.dtype)


def discard_head_forward(hidden_states, weight, bias):
    """hidden_states: (B, S, H) f32; weight: (1, H); bias: (1,). Returns (B, N_HANDS, 1)."""
    B, S, H = hidden_states.shape
    w2 = weight.reshape(1, H)
    b2 = bias.reshape(1, 1)

    out2d = pl.pallas_call(
        discard_head_kernel,
        out_shape=jax.ShapeDtypeStruct((B, N_HANDS), jnp.float32),
        grid_spec=pltpu.PrefetchScalarGridSpec(
            num_scalar_prefetch=0,
            grid=(1,),  # single step: collapse the grid, one DMA per operand
            in_specs=[
                pl.BlockSpec((B, S, H), lambda i: (0, 0, 0)),
                pl.BlockSpec((1, H), lambda i: (0, 0)),
                pl.BlockSpec((1, 1), lambda i: (0, 0)),
            ],
            out_specs=pl.BlockSpec((B, N_HANDS), lambda i: (0, 0)),
        ),
        compiler_params=pltpu.CompilerParams(
            dimension_semantics=("arbitrary",)),
    )(hidden_states, w2, b2)

    # match PyTorch output shape (B, N_HANDS, 1); the reshape outside the kernel is free
    # and keeps the in-kernel store lane-dense (14 lanes instead of 1).
    return out2d[..., None]


if __name__ == "__main__":
    key = jax.random.PRNGKey(0)
    k_h, k_w, k_b = jax.random.split(key, 3)

    # deterministic example inputs / parameters
    hidden_states = jax.random.normal(k_h, (BATCH, SEQ, HIDDEN), dtype=jnp.float32)
    weight = 0.02 * jax.random.normal(k_w, (1, HIDDEN), dtype=jnp.float32)  # nn.Linear(H, 1).weight
    bias = 0.02 * jax.random.normal(k_b, (1,), dtype=jnp.float32)           # nn.Linear(H, 1).bias

    out = discard_head_forward(hidden_states, weight, bias)
    out = jax.block_until_ready(out)

    # pure-JAX reference: Linear applied to hidden_states[:, 1:n_hands+1]
    ref = jnp.einsum('bnh,oh->bno', hidden_states[:, 1:N_HANDS + 1], weight) + bias

    assert out.shape == (BATCH, N_HANDS, 1)
    assert jnp.allclose(out, ref, atol=1e-5, rtol=1e-5), "mismatch vs reference"
    print("KERNEL_OK")
</pallas_src>

<mosaic_0001>
module attributes {stable_mosaic.version = 11 : i64} {
  func.func @discard_head_kernel(%arg0: i32, %arg1: memref<2x24x32xf32, #tpu.memory_space<vmem>>, %arg2: memref<1x32xf32, #tpu.memory_space<vmem>>, %arg3: memref<1x1xf32, #tpu.memory_space<vmem>>, %arg4: memref<2x14xf32, #tpu.memory_space<vmem>>) attributes {dimension_semantics = [#tpu.dimension_semantics<arbitrary>], iteration_bounds = array<i64: 1>, scalar_prefetch = 0 : i64, scratch_operands = 0 : i64, tpu.core_type = #tpu.core_type<tc>, window_params = [{pipeline_mode = #tpu.pipeline_mode<synchronous>, transform_indices = @transform_0, window_bounds = array<i64: 2, 24, 32>}, {pipeline_mode = #tpu.pipeline_mode<synchronous>, transform_indices = @transform_1, window_bounds = array<i64: 1, 32>}, {pipeline_mode = #tpu.pipeline_mode<synchronous>, transform_indices = @transform_2, window_bounds = array<i64: 1, 1>}, {pipeline_mode = #tpu.pipeline_mode<synchronous>, transform_indices = @transform_3, window_bounds = array<i64: 2, 14>}]} {
    %c0 = arith.constant 0 : index
    %c0_0 = arith.constant 0 : index
    %c0_1 = arith.constant 0 : index
    %0 = vector.load %arg1[%c0, %c0_0, %c0_1] : memref<2x24x32xf32, #tpu.memory_space<vmem>>, vector<2x24x32xf32>
    %c0_2 = arith.constant 0 : index
    %c0_3 = arith.constant 0 : index
    %1 = vector.load %arg2[%c0_2, %c0_3] : memref<1x32xf32, #tpu.memory_space<vmem>>, vector<1x32xf32>
    %2 = vector.shape_cast %1 : vector<1x32xf32> to vector<32xf32>
    %3 = vector.shape_cast %2 : vector<32xf32> to vector<1x1x32xf32>
    %4 = vector.broadcast %3 : vector<1x1x32xf32> to vector<2x24x32xf32>
    %5 = arith.mulf %0, %4 : vector<2x24x32xf32>
    %cst = arith.constant dense<0.000000e+00> : vector<2x24xf32>
    %6 = vector.multi_reduction <add>, %5, %cst [2] : vector<2x24x32xf32> to vector<2x24xf32>
    %c0_4 = arith.constant 0 : index
    %c0_5 = arith.constant 0 : index
    %7 = vector.load %arg3[%c0_4, %c0_5] : memref<1x1xf32, #tpu.memory_space<vmem>>, vector<1x1xf32>
    %8 = vector.extract %7[0, 0] : f32 from vector<1x1xf32>
    %9 = vector.broadcast %8 : f32 to vector<2x24xf32>
    %10 = arith.addf %6, %9 : vector<2x24xf32>
    %11 = vector.extract_strided_slice %10 {offsets = [0, 1], sizes = [2, 14], strides = [1, 1]} : vector<2x24xf32> to vector<2x14xf32>
    %c0_6 = arith.constant 0 : index
    %c0_7 = arith.constant 0 : index
    %12 = vector.load %arg4[%c0_6, %c0_7] : memref<2x14xf32, #tpu.memory_space<vmem>>, vector<2x14xf32>
    tpu.vector_store %arg4[%c0_6, %c0_7], %11 {strides = array<i32>} : memref<2x14xf32, #tpu.memory_space<vmem>>, vector<2x14xf32>,
    return
  }
  func.func @transform_0(%arg0: i32) -> (i32, i32, i32) {
    %c0_i32 = arith.constant 0 : i32
    %c0_i32_0 = arith.constant 0 : i32
    %c0_i32_1 = arith.constant 0 : i32
    %c0_i32_2 = arith.constant 0 : i32
    return %c0_i32, %c0_i32_0, %c0_i32_1 : i32, i32, i32
  }
  func.func @transform_1(%arg0: i32) -> (i32, i32) {
    %c0_i32 = arith.constant 0 : i32
    %c0_i32_0 = arith.constant 0 : i32
    %c0_i32_1 = arith.constant 0 : i32
    return %c0_i32, %c0_i32_0 : i32, i32
  }
  func.func @transform_2(%arg0: i32) -> (i32, i32) {
    %c0_i32 = arith.constant 0 : i32
    %c0_i32_0 = arith.constant 0 : i32
    %c0_i32_1 = arith.constant 0 : i32
    return %c0_i32, %c0_i32_0 : i32, i32
  }
  func.func @transform_3(%arg0: i32) -> (i32, i32) {
    %c0_i32 = arith.constant 0 : i32
    %c0_i32_0 = arith.constant 0 : i32
    %c0_i32_1 = arith.constant 0 : i32
    return %c0_i32, %c0_i32_0 : i32, i32
  }
}

</mosaic_0001>

<bundles_post_ra>
// kernel: tpu_custom_call.1
= control target key start
LH: loop header
LB: loop body
LE: loop exit
PB: predicated region body
PF: predicated region fallthrough
CT: control target
= control target key end

     0   :  { %s200_s0 = inlined_call_operand.hbm [shape: f32[2,24,32], index: 0, kind: input, shape index: {}]   ;;  %s201_s1 = inlined_call_operand.vmem [shape: f32[1,32], index: 1, kind: input, shape index: {}]   ;;  %s202_s2 = inlined_call_operand.<no memory space> [shape: f32[1,1], index: 2, kind: input, shape index: {}]   ;;  %s203_s3 = inlined_call_operand.hbm [shape: f32[2,14], index: 3, kind: output, shape index: {}]  }
   0x1   :  { %v8_v0 = vstv %s202_s2 }
   0x2   :  { %9 = vst [vmem:[#allocation2] sm:$0x1] %v8_v0 }
   0x3   :  { %10 = vsyncpa [#allocation4], 0 }
   0x4   :  { %11 = vsyncpa [#allocation5], 0  ;;  %s164_s14 = smov [#allocation3]  }
   0x5   :  { %s17_s15 = sshll.u32 %s164_s14, 4  ;;  %s18_s15 = int_to_ptr.vmem [resolvable:$true] %s17_s15 }
   0x6   :  { %s128_s16 = scalar_lea.vmem %s18_s15, 768  ;;  %p133_p1 = scmp.lt.s32.totalorder %s18_s15, %s18_s15 }
   0x7   :  { %p129_p0 = scmp.ne.s32.totalorder %s18_s15, %s128_s16  ;;  %p134_p2 = scmp.lt.s32.totalorder %s128_s16, %s128_s16 }
   0x9   :  { %p135_p3 = por %p134_p2, %p133_p1 }
   0xb   :  { %p136_p4 = pnand %p135_p3, %p129_p0 }
   0xd   :  { %139 = shalt.err (!%p136_p4)
}
   0xe   :  { %s165_s17 = smov 128   ;;  %s166_s18 = smov 8  }
   0xf   :  { %23 = dma.hbm_to_vmem [thread:$0]  %s200_s0, 768, %s18_s15, [#allocation4], %s165_s17, %s165_s17, %s166_s18  }
  0x10   :  { %160 = dma.done.wait [#allocation4], 768  }
  0x11   :  { %161 = vsyncadd [#allocation4], 4294966528  ;;  %v33_v1 = vld [vmem:[#allocation3 + $0x18] sm:$0xff]  ;;  %vm46_vm0 = vcmask 261120   ;;  %v31_v3 = vld [vmem:[#allocation3] sm:$0xff]  ;;  %v70_v15 = vlaneseq  ;;  %vm82_vm1 = vcmask 121912  }
  0x12   :  { %v113_v2 = vld [vmem:[%s201_s1] ss:$0 sm:$0xff]  ;;  %v34_v6 = vld [vmem:[#allocation3 + $0x20] sm:$0xff]  ;;  %v32_v7 = vld [vmem:[#allocation3 + $0x8] sm:$0xff]  ;;  %vm93_vm2 = vcmask 1042434   ;;  %s167_s1 = smov [#allocation6]  }
  0x13   :  { %v44_v4 = vmul.f32 %v113_v2, %v33_v1  ;;  %v42_v5 = vmul.f32 %v113_v2, %v31_v3  ;;  %v59_v8 = vld [vmem:[#allocation2] sm:$0x1]  ;;  %v45_v9 = vmul.f32 %v113_v2, %v34_v6  ;;  %v43_v10 = vmul.f32 %v113_v2, %v32_v7  ;;  %s104_s22 = sshll.u32 %s167_s1, 4  ;;  %s105_s22 = int_to_ptr.vmem [resolvable:$true] %s104_s22 }
  0x14   :  { %114 = vpush %v59_v8  ;;  %v71_v16 = vand.u32 127, %v70_v15  ;;  %v74_v18 = vshrl.u32 %v70_v15, 7  ;;  %vm96_vm3 = vcmask 108545   ;;  %s140_s23 = scalar_lea.vmem %s105_s22, 32  ;;  %p145_p6 = scmp.lt.s32.totalorder %s105_s22, %s105_s22 }
  0x15   :  { %v53_v11 = vsel %vm46_vm0, %v44_v4, 0.0  ;;  %v47_v12 = vsel %vm46_vm0, %v42_v5, 0.0  ;;  %v56_v13 = vsel %vm46_vm0, %v45_v9, 0.0  ;;  %v50_v14 = vsel %vm46_vm0, %v43_v10, 0.0  ;;  %p141_p5 = scmp.ne.s32.totalorder %s105_s22, %s140_s23  ;;  %p146_p7 = scmp.lt.s32.totalorder %s140_s23, %s140_s23 }
  0x16   :  { %54 = vadd.xlane.f32.xlu1 %v53_v11  ;;  %48 = vadd.xlane.f32.xlu0 %v47_v12  ;;  %v72_v17 = vadd.s32 1, %v71_v16  ;;  %v77_v19 = vadd.s32 4294967289, %v71_v16 }
  0x17   :  { %p147_p8 = por %p146_p7, %p145_p6 }
  0x18   :  { %v75_v23 = vsub.s32 %v72_v17, %v74_v18  ;;  %v80_v26 = vsub.s32 %v77_v19, %v74_v18 }
  0x19   :  { %p148_p9 = pnand %p147_p8, %p141_p5 }
  0x1a   :  { %57 = vadd.xlane.f32.xlu1 %v56_v13  ;;  %51 = vadd.xlane.f32.xlu0 %v50_v14 }
  0x45   :  { %s115_s0 = spop %114 }
  0x46   :  { %v61_v20 = vstv %s115_s0 }
  0x9f   :  { %v55_v21 = vpop.xlane.xlu1 %54  ;;  %v49_v22 = vpop.xlane.xlu0 %48 }
  0xa0   :  { %v64_v24 = vadd.f32 %v61_v20, %v55_v21  ;;  %v62_v25 = vadd.f32 %v61_v20, %v49_v22 }
  0xa2   :  { %v87_v31 = vrot.slane %v64_v24, %v75_v23  ;;  %v76_v32 = vrot.slane %v62_v25, %v75_v23 }
  0xa3   :  { %v58_v27 = vpop.xlane.xlu1 %57  ;;  %v52_v28 = vpop.xlane.xlu0 %51 }
  0xa4   :  { %v65_v29 = vadd.f32 %v61_v20, %v58_v27  ;;  %v63_v30 = vadd.f32 %v61_v20, %v52_v28 }
  0xa6   :  { %v91_v33 = vrot.slane %v65_v29, %v80_v26  ;;  %v81_v34 = vrot.slane %v63_v30, %v80_v26 }
  0xa8   :  { %v83_v35 = vsel %vm82_vm1, %v81_v34, %v76_v32  ;;  %v92_v36 = vsel %vm82_vm1, %v91_v33, %v87_v31 }
  0xa9   :  { %v94_v37 = vsel %vm93_vm2, %v92_v36, %v83_v35 }
  0xaa   :  { %97 = vst.msk [vmem:[#allocation6 - $0x1] sm:$0x6] %vm96_vm3, %v94_v37 }
  0xab   :  { %151 = shalt.err (!%p148_p9)
}
  0xac   :  { %107 = dma.vmem_to_hbm [thread:$0]  %s105_s22, 32, %s203_s3, [#allocation5]  }
  0xad   :  { %162 = dma.done.wait [#allocation5], 32  }
  0xae   :  { %163 = vsyncadd [#allocation5], 4294967264 }
  0xaf   :  { %111 = vsyncpa [#allocation4], 1 }
  0xb0   :  { %112 = vsyncpa [#allocation5], 1 }

</bundles_post_ra>
